<compile_context>
chip_gen: v7x
topology: tpu7x:2x2x1
jax: 0.10.0
libtpu: 0.0.40
codegen_flags: <defaults>
</compile_context>

<pallas_src>
import math

import jax
import jax.numpy as jnp
from jax.experimental import pallas as pl
from jax.experimental.pallas import tpu as pltpu


def _cdiv(a, b):
    return -(-a // b)


def _round_up(a, b):
    return _cdiv(a, b) * b


def _num_tensorcores():
    # v7x has 2 TensorCores per chip; v5e/v6e have 1.
    try:
        kind = jax.devices()[0].device_kind.lower()
    except Exception:
        return 1
    return 2 if "v7" in kind else 1


def _make_policy_kernel(n_actions, task_dim, use_vpu_tasks):
    def policy_mlp_kernel(s_ref, t_ref,
                          w1s_ref, w1t_ref, b1_ref,
                          w2_ref, b2_ref,
                          wh_ref, bh_ref,
                          out_ref):
        # ---- layer 1: concat([states, tasks]) fused as a split matmul -------
        s = s_ref[...].astype(jnp.bfloat16)
        h = jnp.dot(s, w1s_ref[...], preferred_element_type=jnp.float32)
        if use_vpu_tasks:
            # task_dim is tiny (typically 1): a K=task_dim MXU matmul runs at
            # <1% utilization, so fold it onto the VPU as broadcast FMAs.
            t = t_ref[...]                      # (tile_b, task_dim) f32
            w1t = w1t_ref[...]                  # (task_dim, h1)     f32
            for k in range(task_dim):
                h = h + t[:, k:k + 1] * w1t[k:k + 1, :]
        else:
            h = h + jnp.dot(t_ref[...].astype(jnp.bfloat16),
                            w1t_ref[...].astype(jnp.bfloat16),
                            preferred_element_type=jnp.float32)
        h = jnp.maximum(h + b1_ref[...], 0.0)

        # ---- layer 2 ---------------------------------------------------------
        h = jnp.dot(h.astype(jnp.bfloat16), w2_ref[...],
                    preferred_element_type=jnp.float32) + b2_ref[...]
        h = jnp.maximum(h, 0.0)

        # ---- fused lane-padded heads: one matmul -> [mu | log_std | 0-pad] ---
        y = jnp.dot(h.astype(jnp.bfloat16), wh_ref[...],
                    preferred_element_type=jnp.float32) + bh_ref[...]

        # std = exp(clip(log_std, -20, 2)) only on the std lanes; the mask is a
        # single (1, out_lanes) iota row broadcast against y (no full int32
        # tile).  clip-before-exp also keeps ragged-tail garbage rows finite.
        col = jax.lax.broadcasted_iota(jnp.int32, (1, y.shape[-1]), 1)
        std_part = jnp.exp(jnp.clip(y, -20.0, 2.0))
        out_ref[...] = jnp.where(col >= n_actions, std_part, y)

    return policy_mlp_kernel


def policy_forward(states, tasks, params, n_actions):
    """Returns (mu, std): parameters of the Normal distribution from forward()."""
    states = states.astype(jnp.float32)
    tasks = tasks.astype(jnp.float32)

    b, n_states = states.shape
    task_dim = tasks.shape[1]

    w1s, w1t, b1 = params["w1s"], params["w1t"], params["b1"]
    w2, b2 = params["w2"], params["b2"]
    wh, bh = params["whead"], params["bhead"]
    h1 = w1s.shape[1]
    h2 = w2.shape[1]
    out_lanes = wh.shape[1]            # lane-dense head width (multiple of 128)

    use_vpu_tasks = task_dim <= 8

    # ---- batch tiling: big tiles, ragged tail handled by Pallas -------------
    num_tc = _num_tensorcores()
    max_tile = 1024
    b8 = _round_up(b, 8)
    if b8 > max_tile * num_tc:
        tile_b = max_tile
    else:
        # Split into one step per TensorCore only when the batch is big enough
        # for megacore sharding to pay off; otherwise use one big tile.
        steps = num_tc if b8 >= 16 * num_tc else 1
        tile_b = min(max_tile, _round_up(_cdiv(b8, steps), 8))
    grid_steps = _cdiv(b, tile_b)
    grid = (grid_steps,)

    def row_spec(d):
        return pl.BlockSpec((tile_b, d), lambda i: (i, 0))

    def resident_spec(arr):
        # Constant index_map: block never changes, so weights stay VMEM
        # resident across grid steps.  (At very large hidden sizes, single
        # buffering these would halve their VMEM footprint.)
        return pl.BlockSpec(arr.shape, lambda i: (0, 0))

    flops = 2 * grid_steps * tile_b * (n_states * h1 + task_dim * h1
                                       + h1 * h2 + h2 * out_lanes)
    param_bytes = sum(int(p.size) * p.dtype.itemsize
                      for p in (w1s, w1t, b1, w2, b2, wh, bh))
    act_bytes = (int(states.size) + int(tasks.size) + b * out_lanes) * 4
    cost = pl.CostEstimate(flops=int(flops),
                           transcendentals=int(grid_steps * tile_b * out_lanes),
                           bytes_accessed=int(param_bytes + act_bytes))

    # Raise the scoped-VMEM limit only if the (double-buffered) resident
    # weights + tiles would not fit the 32 MiB default — matters on v7x's
    # 64 MiB VMEM when hidden_layers are scaled up (>= ~1024).
    tile_io_bytes = 4 * tile_b * (n_states + task_dim + out_lanes)
    vmem_est = 2 * (param_bytes + tile_io_bytes) + 4 * tile_b * (h1 + h2 + out_lanes)
    cp_kwargs = dict(dimension_semantics=("parallel",))
    if vmem_est > (32 << 20):
        cp_kwargs["vmem_limit_bytes"] = int(min(vmem_est + (8 << 20), 64 << 20))

    kernel = _make_policy_kernel(n_actions, task_dim, use_vpu_tasks)

    out = pl.pallas_call(
        kernel,
        out_shape=jax.ShapeDtypeStruct((b, out_lanes), jnp.float32),
        grid=grid,
        in_specs=[
            row_spec(n_states),        # states tile
            row_spec(task_dim),        # tasks tile
            resident_spec(w1s), resident_spec(w1t), resident_spec(b1),
            resident_spec(w2), resident_spec(b2),
            resident_spec(wh), resident_spec(bh),
        ],
        out_specs=row_spec(out_lanes),  # lane-dense [mu | std | pad] slab
        compiler_params=pltpu.CompilerParams(**cp_kwargs),
        cost_estimate=cost,
    )(states, tasks, w1s, w1t, b1, w2, b2, wh, bh)

    mu = out[:, :n_actions]
    std = out[:, n_actions:2 * n_actions]
    return mu, std


def init_params(key, n_states, task_dim, hidden_layers, n_actions):
    """Deterministic init matching PolicyNetwork.__init__ semantics:
    hidden layers: kaiming (he) normal weights, zero bias;
    mu / log_std heads: xavier uniform weights, zero bias.

    Kernel layout:
      * W1 split into states/tasks halves (fused-concat matmul / VPU FMA),
      * mu and log_std heads fused and zero-padded to a 128-lane slab,
      * MXU weights stored bf16; w1t (VPU path) and biases stay f32 (1, out).
    """
    assert len(hidden_layers) == 2, "kernel implements the 2-hidden-layer MLP"
    d_in = n_states + task_dim
    sizes = [d_in] + list(hidden_layers)

    keys = jax.random.split(key, len(hidden_layers) + 2)
    params = {}

    # Hidden layers: he normal, std = sqrt(2 / fan_in).
    raw_ws = []
    for i, (fan_in, fan_out) in enumerate(zip(sizes[:-1], sizes[1:])):
        std = math.sqrt(2.0 / fan_in)
        w = jax.random.normal(keys[i], (fan_in, fan_out), dtype=jnp.float32) * std
        raw_ws.append(w)
        params[f"b{i+1}"] = jnp.zeros((1, fan_out), dtype=jnp.float32)

    params["w1s"] = raw_ws[0][:n_states, :].astype(jnp.bfloat16)
    params["w1t"] = raw_ws[0][n_states:, :]            # f32: used on the VPU
    params["w2"] = raw_ws[1].astype(jnp.bfloat16)

    last = sizes[-1]
    # mu / log_std heads: xavier uniform, bound = sqrt(6 / (fan_in + fan_out)).
    bound = math.sqrt(6.0 / (last + n_actions))
    wmu = jax.random.uniform(keys[-2], (last, n_actions), dtype=jnp.float32,
                             minval=-bound, maxval=bound)
    wls = jax.random.uniform(keys[-1], (last, n_actions), dtype=jnp.float32,
                             minval=-bound, maxval=bound)
    out_lanes = max(128, _round_up(2 * n_actions, 128))
    pad_cols = out_lanes - 2 * n_actions
    whead = jnp.concatenate(
        [wmu, wls, jnp.zeros((last, pad_cols), dtype=jnp.float32)], axis=1)
    params["whead"] = whead.astype(jnp.bfloat16)
    params["bhead"] = jnp.zeros((1, out_lanes), dtype=jnp.float32)

    # TODO(synk): the action_selector head and the Normal.rsample / tanh /
    # log_prob machinery in sample_or_likelihood are stochastic control flow
    # outside the hot forward pass; the kernel returns the distribution
    # parameters (mu, std) that forward() wraps in torch.distributions.Normal.
    return params


def ref_forward(states, tasks, params, n_actions, use_vpu_tasks=True):
    """Pure-JAX reference mirroring the kernel's bf16-operand / f32-acc math."""
    s = states.astype(jnp.bfloat16)
    h = jnp.dot(s, params["w1s"], preferred_element_type=jnp.float32)
    if use_vpu_tasks:
        h = h + jnp.dot(tasks.astype(jnp.float32), params["w1t"],
                        precision=jax.lax.Precision.HIGHEST)
    else:
        h = h + jnp.dot(tasks.astype(jnp.bfloat16),
                        params["w1t"].astype(jnp.bfloat16),
                        preferred_element_type=jnp.float32)
    h = jnp.maximum(h + params["b1"], 0.0)
    h = jnp.dot(h.astype(jnp.bfloat16), params["w2"],
                preferred_element_type=jnp.float32) + params["b2"]
    h = jnp.maximum(h, 0.0)
    y = jnp.dot(h.astype(jnp.bfloat16), params["whead"],
                preferred_element_type=jnp.float32) + params["bhead"]
    mu = y[:, :n_actions]
    std = jnp.exp(jnp.clip(y[:, n_actions:2 * n_actions], -20.0, 2.0))
    return mu, std


if __name__ == "__main__":
    # Small shapes consistent with the module's forward.
    batch = 2
    n_states = 16
    task_dim = 1
    hidden_layers = [32, 32]
    n_actions = 4

    key = jax.random.PRNGKey(0)
    k_params, k_states, k_tasks = jax.random.split(key, 3)

    params = init_params(k_params, n_states, task_dim, hidden_layers, n_actions)
    states = jax.random.normal(k_states, (batch, n_states), dtype=jnp.float32)
    tasks = jax.random.normal(k_tasks, (batch, task_dim), dtype=jnp.float32)

    mu, std = policy_forward(states, tasks, params, n_actions)
    jax.block_until_ready((mu, std))

    mu_ref, std_ref = ref_forward(states, tasks, params, n_actions)
    assert mu.shape == (batch, n_actions) and std.shape == (batch, n_actions)
    assert jnp.allclose(mu, mu_ref, atol=1e-2, rtol=1e-2), "mu mismatch"
    assert jnp.allclose(std, std_ref, atol=1e-2, rtol=1e-2), "std mismatch"
    assert bool(jnp.all(std > 0)), "std must be positive"

    print("KERNEL_OK")
</pallas_src>

<mosaic_0001>
module attributes {stable_mosaic.version = 11 : i64} {
  func.func @policy_mlp_kernel(%arg0: i32, %arg1: memref<8x16xf32, #tpu.memory_space<vmem>>, %arg2: memref<8x1xf32, #tpu.memory_space<vmem>>, %arg3: memref<16x32xbf16, #tpu.memory_space<vmem>>, %arg4: memref<1x32xf32, #tpu.memory_space<vmem>>, %arg5: memref<1x32xf32, #tpu.memory_space<vmem>>, %arg6: memref<32x32xbf16, #tpu.memory_space<vmem>>, %arg7: memref<1x32xf32, #tpu.memory_space<vmem>>, %arg8: memref<32x128xbf16, #tpu.memory_space<vmem>>, %arg9: memref<1x128xf32, #tpu.memory_space<vmem>>, %arg10: memref<8x128xf32, #tpu.memory_space<vmem>>) attributes {dimension_semantics = [#tpu.dimension_semantics<parallel>], iteration_bounds = array<i64: 1>, scalar_prefetch = 0 : i64, scratch_operands = 0 : i64, tpu.core_type = #tpu.core_type<tc>, window_params = [{transform_indices = @transform_0, window_bounds = array<i64: 8, 16>}, {transform_indices = @transform_1, window_bounds = array<i64: 8, 1>}, {pipeline_mode = #tpu.pipeline_mode<synchronous>, transform_indices = @transform_2, window_bounds = array<i64: 16, 32>}, {pipeline_mode = #tpu.pipeline_mode<synchronous>, transform_indices = @transform_3, window_bounds = array<i64: 1, 32>}, {pipeline_mode = #tpu.pipeline_mode<synchronous>, transform_indices = @transform_4, window_bounds = array<i64: 1, 32>}, {pipeline_mode = #tpu.pipeline_mode<synchronous>, transform_indices = @transform_5, window_bounds = array<i64: 32, 32>}, {pipeline_mode = #tpu.pipeline_mode<synchronous>, transform_indices = @transform_6, window_bounds = array<i64: 1, 32>}, {pipeline_mode = #tpu.pipeline_mode<synchronous>, transform_indices = @transform_7, window_bounds = array<i64: 32, 128>}, {pipeline_mode = #tpu.pipeline_mode<synchronous>, transform_indices = @transform_8, window_bounds = array<i64: 1, 128>}, {transform_indices = @transform_9, window_bounds = array<i64: 8, 128>}]} {
    %c0 = arith.constant 0 : index
    %c0_0 = arith.constant 0 : index
    %0 = vector.load %arg1[%c0, %c0_0] : memref<8x16xf32, #tpu.memory_space<vmem>>, vector<8x16xf32>
    %1 = arith.truncf %0 : vector<8x16xf32> to vector<8x16xbf16>
    %c0_1 = arith.constant 0 : index
    %c0_2 = arith.constant 0 : index
    %2 = vector.load %arg3[%c0_1, %c0_2] : memref<16x32xbf16, #tpu.memory_space<vmem>>, vector<16x32xbf16>
    %cst = arith.constant dense<0.000000e+00> : vector<8x32xf32>
    %3 = tpu.matmul %1, %2, %cst {dimension_numbers = #tpu.dot_dimension_numbers<[1], [0], [0], [1], [0, 0, 1, 1], [], []>} : vector<8x16xbf16>, vector<16x32xbf16>, vector<8x32xf32> -> vector<8x32xf32>
    %c0_3 = arith.constant 0 : index
    %c0_4 = arith.constant 0 : index
    %4 = vector.load %arg2[%c0_3, %c0_4] : memref<8x1xf32, #tpu.memory_space<vmem>>, vector<8x1xf32>
    %c0_5 = arith.constant 0 : index
    %c0_6 = arith.constant 0 : index
    %5 = vector.load %arg4[%c0_5, %c0_6] : memref<1x32xf32, #tpu.memory_space<vmem>>, vector<1x32xf32>
    %6 = vector.broadcast %4 : vector<8x1xf32> to vector<8x32xf32>
    %7 = vector.broadcast %5 : vector<1x32xf32> to vector<8x32xf32>
    %8 = arith.mulf %6, %7 : vector<8x32xf32>
    %9 = arith.addf %3, %8 : vector<8x32xf32>
    %c0_7 = arith.constant 0 : index
    %c0_8 = arith.constant 0 : index
    %10 = vector.load %arg5[%c0_7, %c0_8] : memref<1x32xf32, #tpu.memory_space<vmem>>, vector<1x32xf32>
    %11 = vector.broadcast %10 : vector<1x32xf32> to vector<8x32xf32>
    %12 = arith.addf %9, %11 : vector<8x32xf32>
    %cst_9 = arith.constant 0.000000e+00 : f32
    %13 = vector.broadcast %cst_9 : f32 to vector<8x32xf32>
    %14 = arith.maximumf %12, %13 : vector<8x32xf32>
    %15 = arith.truncf %14 : vector<8x32xf32> to vector<8x32xbf16>
    %c0_10 = arith.constant 0 : index
    %c0_11 = arith.constant 0 : index
    %16 = vector.load %arg6[%c0_10, %c0_11] : memref<32x32xbf16, #tpu.memory_space<vmem>>, vector<32x32xbf16>
    %cst_12 = arith.constant dense<0.000000e+00> : vector<8x32xf32>
    %17 = tpu.matmul %15, %16, %cst_12 {dimension_numbers = #tpu.dot_dimension_numbers<[1], [0], [0], [1], [0, 0, 1, 1], [], []>} : vector<8x32xbf16>, vector<32x32xbf16>, vector<8x32xf32> -> vector<8x32xf32>
    %c0_13 = arith.constant 0 : index
    %c0_14 = arith.constant 0 : index
    %18 = vector.load %arg7[%c0_13, %c0_14] : memref<1x32xf32, #tpu.memory_space<vmem>>, vector<1x32xf32>
    %19 = vector.broadcast %18 : vector<1x32xf32> to vector<8x32xf32>
    %20 = arith.addf %17, %19 : vector<8x32xf32>
    %cst_15 = arith.constant 0.000000e+00 : f32
    %21 = vector.broadcast %cst_15 : f32 to vector<8x32xf32>
    %22 = arith.maximumf %20, %21 : vector<8x32xf32>
    %23 = arith.truncf %22 : vector<8x32xf32> to vector<8x32xbf16>
    %c0_16 = arith.constant 0 : index
    %c0_17 = arith.constant 0 : index
    %24 = vector.load %arg8[%c0_16, %c0_17] : memref<32x128xbf16, #tpu.memory_space<vmem>>, vector<32x128xbf16>
    %cst_18 = arith.constant dense<0.000000e+00> : vector<8x128xf32>
    %25 = tpu.matmul %23, %24, %cst_18 {dimension_numbers = #tpu.dot_dimension_numbers<[1], [0], [0], [1], [0, 0, 1, 1], [], []>} : vector<8x32xbf16>, vector<32x128xbf16>, vector<8x128xf32> -> vector<8x128xf32>
    %c0_19 = arith.constant 0 : index
    %c0_20 = arith.constant 0 : index
    %26 = vector.load %arg9[%c0_19, %c0_20] : memref<1x128xf32, #tpu.memory_space<vmem>>, vector<1x128xf32>
    %27 = vector.broadcast %26 : vector<1x128xf32> to vector<8x128xf32>
    %28 = arith.addf %25, %27 : vector<8x128xf32>
    %29 = tpu.iota {dimensions = array<i32: 1>} : vector<1x128xi32>
    %cst_21 = arith.constant -2.000000e+01 : f32
    %cst_22 = arith.constant 2.000000e+00 : f32
    %30 = vector.broadcast %cst_21 : f32 to vector<8x128xf32>
    %31 = arith.maximumf %30, %28 : vector<8x128xf32>
    %32 = vector.broadcast %cst_22 : f32 to vector<8x128xf32>
    %33 = arith.minimumf %32, %31 : vector<8x128xf32>
    %34 = math.exp %33 : vector<8x128xf32>
    %c4_i32 = arith.constant 4 : i32
    %35 = vector.broadcast %c4_i32 : i32 to vector<1x128xi32>
    %36 = arith.cmpi sge, %29, %35 : vector<1x128xi32>
    %37 = vector.shape_cast %36 : vector<1x128xi1> to vector<1x128xi1>
    %38 = vector.broadcast %37 : vector<1x128xi1> to vector<8x128xi1>
    %39 = arith.select %38, %34, %28 : vector<8x128xi1>, vector<8x128xf32>
    %c0_23 = arith.constant 0 : index
    %c0_24 = arith.constant 0 : index
    %40 = vector.load %arg10[%c0_23, %c0_24] : memref<8x128xf32, #tpu.memory_space<vmem>>, vector<8x128xf32>
    tpu.vector_store %arg10[%c0_23, %c0_24], %39 {strides = array<i32>} : memref<8x128xf32, #tpu.memory_space<vmem>>, vector<8x128xf32>,
    return
  }
  func.func @transform_0(%arg0: i32) -> (i32, i32) {
    %c0_i32 = arith.constant 0 : i32
    %c0_i32_0 = arith.constant 0 : i32
    return %arg0, %c0_i32 : i32, i32
  }
  func.func @transform_1(%arg0: i32) -> (i32, i32) {
    %c0_i32 = arith.constant 0 : i32
    %c0_i32_0 = arith.constant 0 : i32
    return %arg0, %c0_i32 : i32, i32
  }
  func.func @transform_2(%arg0: i32) -> (i32, i32) {
    %c0_i32 = arith.constant 0 : i32
    %c0_i32_0 = arith.constant 0 : i32
    %c0_i32_1 = arith.constant 0 : i32
    return %c0_i32, %c0_i32_0 : i32, i32
  }
  func.func @transform_3(%arg0: i32) -> (i32, i32) {
    %c0_i32 = arith.constant 0 : i32
    %c0_i32_0 = arith.constant 0 : i32
    %c0_i32_1 = arith.constant 0 : i32
    return %c0_i32, %c0_i32_0 : i32, i32
  }
  func.func @transform_4(%arg0: i32) -> (i32, i32) {
    %c0_i32 = arith.constant 0 : i32
    %c0_i32_0 = arith.constant 0 : i32
    %c0_i32_1 = arith.constant 0 : i32
    return %c0_i32, %c0_i32_0 : i32, i32
  }
  func.func @transform_5(%arg0: i32) -> (i32, i32) {
    %c0_i32 = arith.constant 0 : i32
    %c0_i32_0 = arith.constant 0 : i32
    %c0_i32_1 = arith.constant 0 : i32
    return %c0_i32, %c0_i32_0 : i32, i32
  }
  func.func @transform_6(%arg0: i32) -> (i32, i32) {
    %c0_i32 = arith.constant 0 : i32
    %c0_i32_0 = arith.constant 0 : i32
    %c0_i32_1 = arith.constant 0 : i32
    return %c0_i32, %c0_i32_0 : i32, i32
  }
  func.func @transform_7(%arg0: i32) -> (i32, i32) {
    %c0_i32 = arith.constant 0 : i32
    %c0_i32_0 = arith.constant 0 : i32
    %c0_i32_1 = arith.constant 0 : i32
    return %c0_i32, %c0_i32_0 : i32, i32
  }
  func.func @transform_8(%arg0: i32) -> (i32, i32) {
    %c0_i32 = arith.constant 0 : i32
    %c0_i32_0 = arith.constant 0 : i32
    %c0_i32_1 = arith.constant 0 : i32
    return %c0_i32, %c0_i32_0 : i32, i32
  }
  func.func @transform_9(%arg0: i32) -> (i32, i32) {
    %c0_i32 = arith.constant 0 : i32
    %c0_i32_0 = arith.constant 0 : i32
    return %arg0, %c0_i32 : i32, i32
  }
}

</mosaic_0001>

<bundles_post_ra>
// kernel: tpu_custom_call.1
= control target key start
LH: loop header
LB: loop body
LE: loop exit
PB: predicated region body
PF: predicated region fallthrough
CT: control target
= control target key end

     0   :  { %14 = vsyncpa [#allocation3], 0  ;;  %s556_s0 = inlined_call_operand.vmem [shape: f32[2,16], index: 0, kind: input, shape index: {}]   ;;  %s557_s1 = inlined_call_operand.vmem [shape: f32[2,1], index: 1, kind: input, shape index: {}]   ;;  %s558_s2 = inlined_call_operand.hbm [shape: bf16[16,32], index: 2, kind: input, shape index: {}]   ;;  %s559_s3 = inlined_call_operand.vmem [shape: f32[1,32], index: 3, kind: input, shape index: {}]   ;;  %s560_s4 = inlined_call_operand.vmem [shape: f32[1,32], index: 4, kind: input, shape index: {}]   ;;  %s561_s5 = inlined_call_operand.vmem [shape: bf16[32,32], index: 5, kind: input, shape index: {}]   ;;  %s562_s6 = inlined_call_operand.vmem [shape: f32[1,32], index: 6, kind: input, shape index: {}]   ;;  %s563_s7 = inlined_call_operand.hbm [shape: bf16[32,128], index: 7, kind: input, shape index: {}]   ;;  %s564_s8 = inlined_call_operand.vmem [shape: f32[1,128], index: 8, kind: input, shape index: {}]   ;;  %s565_s9 = inlined_call_operand.hbm [shape: f32[2,128], index: 9, kind: output, shape index: {}]  }
   0x1   :  { %15 = vsyncpa [#allocation6], 0 }
   0x2   :  { %16 = vsyncpa [#allocation4], 0  ;;  %s436_s30 = smov [#allocation2]   ;;  %s364_s13 = scalar_lea.hbm %s558_s2, 128 }
   0x3   :  { %s26_s10 = sshll.u32 %s436_s30, 4  ;;  %p365_p0 = scmp.ne.s32.totalorder %s558_s2, %s364_s13  ;;  %s27_s10 = int_to_ptr.vmem [resolvable:$true] %s26_s10 }
   0x4   :  { %p368_p1 = scmp.lt.u32.totalorder %s364_s13, %s558_s2 }
   0x6   :  { %p370_p2 = pnand %p368_p1, %p365_p0 }
   0x8   :  { %373 = shalt.err (!%p370_p2)
}
   0x9   :  { %s374_s18 = scalar_lea.vmem %s27_s10, 128  ;;  %p379_p4 = scmp.lt.s32.totalorder %s27_s10, %s27_s10 }
   0xa   :  { %p375_p3 = scmp.ne.s32.totalorder %s27_s10, %s374_s18  ;;  %p380_p5 = scmp.lt.s32.totalorder %s374_s18, %s374_s18 }
   0xc   :  { %p381_p6 = por %p380_p5, %p379_p4 }
   0xe   :  { %p382_p7 = pnand %p381_p6, %p375_p3 }
  0x10   :  { %385 = shalt.err (!%p382_p7)
}
  0x11   :  { %s437_s19 = smov 64   ;;  %s438_s20 = smov 4  }
  0x12   :  { %32 = dma.hbm_to_vmem [thread:$0]  %s558_s2, 128, %s27_s10, [#allocation3], %s437_s19, %s437_s19, %s438_s20  }
  0x13   :  { %s439_s23 = smov [#allocation5]   ;;  %s386_s27 = scalar_lea.hbm %s563_s7, 256 }
  0x14   :  { %s46_s24 = sshll.u32 %s439_s23, 4  ;;  %p387_p8 = scmp.ne.s32.totalorder %s563_s7, %s386_s27  ;;  %s47_s24 = int_to_ptr.vmem [resolvable:$true] %s46_s24 }
  0x15   :  { %p390_p9 = scmp.lt.u32.totalorder %s386_s27, %s563_s7 }
  0x17   :  { %p392_p10 = pnand %p390_p9, %p387_p8 }
  0x19   :  { %395 = shalt.err (!%p392_p10)
}
  0x1a   :  { %s396_s12 = scalar_lea.vmem %s47_s24, 256  ;;  %p401_p12 = scmp.lt.s32.totalorder %s47_s24, %s47_s24 }
  0x1b   :  { %p397_p11 = scmp.ne.s32.totalorder %s47_s24, %s396_s12  ;;  %p402_p13 = scmp.lt.s32.totalorder %s396_s12, %s396_s12 }
  0x1d   :  { %p403_p0 = por %p402_p13, %p401_p12 }
  0x1f   :  { %p404_p1 = pnand %p403_p0, %p397_p11 }
  0x21   :  { %407 = shalt.err (!%p404_p1)
}
  0x22   :  { %52 = dma.hbm_to_vmem [thread:$0]  %s563_s7, 256, %s47_s24, [#allocation6], %s437_s19, %s437_s19, %s438_s20  }
  0x23   :  { %430 = dma.done.wait [#allocation3], 128  }
  0x24   :  { %431 = vsyncadd [#allocation3], 4294967168 }
  0x25   :  { %432 = dma.done.wait [#allocation6], 256  }
  0x26   :  { %433 = vsyncadd [#allocation6], 4294967040  ;;  %v440_v0 = vmov 0.0   ;;  %vm441_vm0 = vmmov 0   ;;  %v442_v1 = vmov 0   ;;  %v357_v2 = vld [vmem:[#allocation2] sm:$0xff]   ;;  %v275_v39 = vlaneseq }
  0x27   :  { %324 = vmatprep.subr.bf16.mxu0 %v440_v0  ;;  %326 = vmatprep.mubr.msk.bf16.mxu0 %vm441_vm0, %v440_v0  ;;  %v62_v3 = vld [vmem:[%s556_s0] sm:$0xff]  ;;  %vm86_vm1 = vcmask 130048   ;;  %v359_v7 = vld [vmem:[%s561_s5 + $0x8] sm:$0xff]   ;;  %vm163_vm2 = vcmask 261120   ;;  %v361_v21 = vld [vmem:[#allocation5 + $0x8] sm:$0xff]  }
  0x28   :  { %356 = vset.pattern.permute.xlu0 %v442_v1  ;;  %330 = vmatprep.subr.bf16.mxu1 %v440_v0  ;;  %v66_v4 = vld [vmem:[%s557_s1] sm:$0xff]  ;;  %v63_v5 = vpack.c.bf16 %v62_v3, %v62_v3  ;;  %v360_v8 = vld [vmem:[#allocation5] sm:$0xff]   ;;  %v276_v40 = vand.u32 127, %v275_v39 }
  0x29   :  { %334 = vmatprep.mubr.msk.bf16.mxu1 %vm441_vm0, %v440_v0  ;;  %325 = vmatpush3.bf16.msra.mxu0 %v357_v2  ;;  %v358_v6 = vld [vmem:[%s561_s5] sm:$0xff]  }
  0x2a   :  { %70 = vperm.xlu0 %356, %v66_v4   ;;  %338 = vmatprep.subr.bf16.mxu0 %v440_v0  ;;  %v304_v9 = vld [vmem:[%s559_s3] ss:$0 sm:$0xff]  ;;  %vm281_vm3 = vcmp.ge.s32.totalorder %v276_v40, 4 }
  0x2b   :  { %331 = vmatpush3.bf16.msra.mxu1 %v358_v6  ;;  %v307_v13 = vld [vmem:[%s560_s4] ss:$0 sm:$0xff] }
  0x2c   :  { %327 = vmatmul.mubr.msk.bf16.vlgmr.msra.gmra.mrb[0].mxu0 %vm86_vm1, %v63_v5  ;;  %332 = vmatprep.subr.bf16.mxu1 %v440_v0  ;;  %v308_v22 = vld [vmem:[%s562_s6] ss:$0 sm:$0xff] }
  0x2d   :  { %342 = vmatprep.mubr.msk.bf16.mxu0 %vm441_vm0, %v440_v0  ;;  %339 = vmatpush3.bf16.msra.mxu0 %v360_v8  ;;  %v312_v30 = vld [vmem:[%s564_s8] ss:$0 sm:$0xff] }
  0x2e   :  { %340 = vmatprep.subr.bf16.mxu0 %v440_v0 }
  0x2f   :  { %333 = vmatpush3.bf16.msra.mxu1 %v359_v7 }
  0x31   :  { %341 = vmatpush3.bf16.msra.mxu0 %v361_v21 }
  0xa9   :  { %v71_v10 = vpop.permute.xlu0 %70 }
  0xaa   :  { %v79_v11 = vmul.f32 %v304_v9, %v71_v10 }
  0xff   :  { %v124_v12 = vpop.f32.mrb[0].mxu0 }
 0x100   :  { %v125_v14 = vadd.f32 %v124_v12, %v79_v11  ;;  %v328_v15 = vpop.f32.mrb[1].mxu0 }
 0x101   :  { %v127_v16 = vpop.f32.mrb[2].mxu0 }
 0x102   :  { %v137_v17 = vadd.f32 %v307_v13, %v125_v14  ;;  %v329_v18 = vpop.f32.mrb[3].mxu0 }
 0x104   :  { %v138_v19 = vmax.f32 %v137_v17, 0.0 }
 0x106   :  { %v139_v20 = vpack.c.bf16 %v138_v19, %v138_v19 }
 0x108   :  { %335 = vmatmul.mubr.msk.bf16.vlgmr.msra.gmra.mrb[0].mxu1 %vm163_vm2, %v139_v20 }
 0x1db   :  { %v201_v23 = vpop.f32.mrb[0].mxu1 }
 0x1dc   :  { %v202_v24 = vadd.f32 %v308_v22, %v201_v23  ;;  %v336_v25 = vpop.f32.mrb[1].mxu1 }
 0x1dd   :  { %v204_v26 = vpop.f32.mrb[2].mxu1 }
 0x1de   :  { %v207_v27 = vmax.f32 %v202_v24, 0.0  ;;  %v337_v28 = vpop.f32.mrb[3].mxu1 }
 0x1e0   :  { %v208_v29 = vpack.c.bf16 %v207_v27, %v207_v27 }
 0x1e2   :  { %343 = vmatmul.mubr.msk.bf16.vlgmr.msra.gmra.mrb[4].mxu0 %vm163_vm2, %v208_v29 }
 0x2b5   :  { %v269_v31 = vpop.f32.mrb[4].mxu0 }
 0x2b6   :  { %v270_v32 = vadd.f32 %v312_v30, %v269_v31  ;;  %v344_v33 = vpop.f32.mrb[5].mxu0 }
 0x2b7   :  { %v272_v34 = vpop.f32.mrb[6].mxu0 }
 0x2b8   :  { %v277_v35 = vmax.f32 %v270_v32, -20.0  ;;  %v345_v36 = vpop.f32.mrb[7].mxu0 }
 0x2ba   :  { %v278_v37 = vmin.f32 %v277_v35, 2.0 }
 0x2bc   :  { %v279_v38 = vmul.f32 1.442695, %v278_v37 }
 0x2be   :  { %362 = vpow2.f32 %v279_v38 }
 0x2c8   :  { %v363_v41 = vpop.eup %362 }
 0x2c9   :  { %v284_v42 = vsel %vm281_vm3, %v363_v41, %v270_v32 }
 0x2ca   :  { %285 = vst [vmem:[#allocation7] sm:$0xff] %v284_v42 }
 0x2cb   :  { %290 = vsyncadd [#allocation4], 96  ;;  %s443_s6 = smov [#allocation7]  }
 0x2cc   :  { %s291_s23 = sshll.u32 %s443_s6, 4  ;;  %s292_s23 = int_to_ptr.vmem [resolvable:$true] %s291_s23 }
 0x2cd   :  { %s408_s8 = scalar_lea.vmem %s292_s23, 32  ;;  %s412_s24 = scalar_lea.vmem %s292_s23, 128 }
 0x2ce   :  { %p409_p2 = scmp.ne.s32.totalorder %s292_s23, %s408_s8  ;;  %p413_p3 = scmp.lt.s32.totalorder %s292_s23, %s292_s23 }
 0x2cf   :  { %p414_p4 = scmp.lt.s32.totalorder %s412_s24, %s408_s8 }
 0x2d1   :  { %p415_p5 = por %p414_p4, %p413_p3 }
 0x2d3   :  { %p416_p6 = pnand %p415_p5, %p409_p2 }
 0x2d5   :  { %419 = shalt.err (!%p416_p6)
}
 0x2d6   :  { %s420_s27 = scalar_lea.hbm %s565_s9, 32 }
 0x2d7   :  { %p421_p7 = scmp.ne.s32.totalorder %s565_s9, %s420_s27  ;;  %p424_p8 = scmp.lt.u32.totalorder %s420_s27, %s565_s9 }
 0x2d9   :  { %p426_p9 = pnand %p424_p8, %p421_p7 }
 0x2db   :  { %429 = shalt.err (!%p426_p9)
}
 0x2dc   :  { %s444_s12 = smov 32   ;;  %s445_s2 = smov 2  }
 0x2dd   :  { %297 = dma.vmem_to_hbm [thread:$0]  %s292_s23, 32, %s565_s9, [#allocation4], %s444_s12, %s444_s12, %s445_s2  }
 0x2de   :  { %434 = dma.done.wait [#allocation4], 128  }
 0x2df   :  { %435 = vsyncadd [#allocation4], 4294967168 }
 0x2e0   :  { %301 = vsyncpa [#allocation3], 1 }
 0x2e1   :  { %302 = vsyncpa [#allocation6], 1 }
 0x2e2   :  { %303 = vsyncpa [#allocation4], 1 }

</bundles_post_ra>
